<compile_context>
chip_gen: v5e
topology: v5e:2x2
jax: 0.10.0
libtpu: 0.0.40
codegen_flags: <defaults>
</compile_context>

<pallas_src>
import jax
import jax.numpy as jnp
from jax.experimental import pallas as pl
from jax.experimental.pallas import tpu as pltpu

_LANE = 128
_SUBLANE = 8


def _round_up(x, m):
    return ((x + m - 1) // m) * m


def _physical_vmem_bytes():
    try:
        return int(pltpu.get_tpu_info().vmem_capacity_bytes)
    except Exception:
        return 64 << 20          # conservative fallback: v7x has 64 MiB per TC


def _default_batch_tile():
    # v5e's MXU is 4x128^2 -> M=128 already saturates it and halves tile VMEM;
    # v6e/v7x (2x256^2) want >= 256 rows per grid step.
    try:
        kind = jax.devices()[0].device_kind.lower()
    except Exception:
        return 256
    if "v5 lite" in kind or "v5e" in kind or "v5lite" in kind:
        return 128
    return 256


# --------------------------------- kernel ------------------------------------

def mlp_kernel(x_ref, w1_ref, b1_ref, w2_ref, b2_ref, o_ref, acc_ref):
    """sigmoid(relu(x @ W1 + b1) @ W2 + b2), streamed over hidden-dim tiles.

    grid = (batch tiles ["parallel"], hidden tiles ["arbitrary"]).
    Per hidden tile: h_k = relu(x @ W1[:, k] + b1[k]) is elementwise over hidden,
    so acc += h_k @ W2[k, :] sums exactly to the full second matmul.
    acc_ref is an f32 (bt, out_p) VMEM accumulator resident across the k axis.
    Dropout layers are identity in inference (PyTorch eval()) mode.
    """
    k = pl.program_id(1)

    @pl.when(k == 0)
    def _():
        acc_ref[...] = jnp.zeros_like(acc_ref)

    # MXU matmuls keep the input dtype (bf16 stays bf16 -> 2x/3x on v6e/v7x)
    # with f32 accumulation; bias/ReLU epilogue stays f32 (fast on all gens).
    h = jnp.dot(x_ref[...], w1_ref[...], preferred_element_type=jnp.float32)
    h = jnp.maximum(h + b1_ref[...], 0.0)
    acc_ref[...] += jnp.dot(h.astype(w2_ref.dtype), w2_ref[...],
                            preferred_element_type=jnp.float32)

    @pl.when(k == pl.num_programs(1) - 1)
    def _():
        # Sigmoid: exp + reciprocal run on the EUP (free slot vs MXU/VPU).
        o_ref[...] = jax.nn.sigmoid(acc_ref[...] + b2_ref[...]).astype(o_ref.dtype)


# --------------------------------- wrapper -----------------------------------

def make_mlp(w1, b1, w2, b2, *, batch_tile=None, hidden_tile=None,
             cast_to_bf16=False, vmem_limit_bytes=None):
    """Pad/stage the parameters ONCE and return a cached forward(x) callable.

    w1: (in_size, hidden), w2: (hidden, out_size) (transposed vs torch Linear).
    cast_to_bf16: run the MXU in bf16 (f32 accumulation + f32 epilogue kept);
    slightly looser tolerance vs an f32 reference is expected when enabled.
    """
    in_size, hidden = w1.shape
    assert b1.shape == (hidden,)
    assert w2.shape[0] == hidden
    out_size = w2.shape[1]
    assert b2.shape == (out_size,)

    if batch_tile is None:
        batch_tile = _default_batch_tile()
    batch_tile = max(_SUBLANE, _round_up(int(batch_tile), _SUBLANE))

    if cast_to_bf16:
        w1 = w1.astype(jnp.bfloat16)
        w2 = w2.astype(jnp.bfloat16)
    w_dtype = w1.dtype
    w_item = jnp.dtype(w_dtype).itemsize

    # Feature padding is done HERE (once), never per call. Tiny problems (every
    # feature dim <= 128) skip padding: full-array blocks are legal under the
    # (8,128) rule and the tiny case is per-call-overhead bound anyway.
    skip_pad = max(in_size, hidden, out_size) <= _LANE
    if skip_pad:
        in_p, hid_p, out_p = in_size, hidden, out_size
        w1p, w2p = w1, w2
        b1p = b1.reshape(1, hidden).astype(jnp.float32)
        b2p = b2.reshape(1, out_size).astype(jnp.float32)
    else:
        # Zero padding is exact: padded hidden units are relu(0)=0 and hit zero
        # rows of W2; padded output columns are sliced off after the call.
        in_p = _round_up(in_size, _LANE)
        hid_p = _round_up(hidden, _LANE)
        out_p = _round_up(out_size, _LANE)
        w1p = jnp.zeros((in_p, hid_p), w_dtype).at[:in_size, :hidden].set(w1)
        w2p = jnp.zeros((hid_p, out_p), w_dtype).at[:hidden, :out_size].set(w2)
        b1p = jnp.zeros((1, hid_p), jnp.float32).at[:, :hidden].set(
            b1.reshape(1, hidden).astype(jnp.float32))
        b2p = jnp.zeros((1, out_p), jnp.float32).at[:, :out_size].set(
            b2.reshape(1, out_size).astype(jnp.float32))

    phys_vmem = _physical_vmem_bytes()
    budget = int(phys_vmem * 0.8)          # leave headroom for compiler scratch

    def _plan(B, x_dtype, out_dtype):
        x_item = jnp.dtype(x_dtype).itemsize
        out_item = jnp.dtype(out_dtype).itemsize
        B_p = _round_up(B, _SUBLANE)

        # ---- hidden tile: stream W1[:, k] / W2[k, :] when weights don't fit.
        def weight_bytes(ht):
            nbuf = 1 if ht == hid_p else 2   # resident weights single-buffered
            return nbuf * ((in_p * ht + ht * out_p) * w_item + ht * 4) + out_p * 4

        if hidden_tile is not None:
            ht = int(hidden_tile)
            assert hid_p % ht == 0 and (ht == hid_p or ht % _LANE == 0), \
                "hidden_tile must divide the (padded) hidden dim in 128-lane units"
        elif skip_pad or weight_bytes(hid_p) <= budget // 2:
            ht = hid_p
        else:
            m = hid_p // _LANE
            ht = _LANE
            for d in range(m, 0, -1):
                if m % d == 0 and weight_bytes(d * _LANE) <= budget // 2:
                    ht = d * _LANE
                    break
            # TODO(synk): no in_size streaming axis yet; an enormous in_size can
            # still exceed the VMEM budget even at ht=128.
        wbytes = weight_bytes(ht)

        # ---- batch tile: fit leftover VMEM, avoid over-padding B, and keep
        #      >= 2 grid steps so both v7x TensorCores get work.
        per_row = (2 * in_p * x_item           # double-buffered x tile
                   + 2 * out_p * out_item      # double-buffered out tile
                   + out_p * 4                 # f32 accumulator scratch
                   + ht * 4)                   # f32 h intermediate
        avail = max(budget - wbytes, 0)
        bt_budget = max(_SUBLANE, (avail // max(per_row, 1)) // _SUBLANE * _SUBLANE)
        cap = min(batch_tile, B_p, bt_budget)
        if B_p >= 256:
            cap = min(cap, _round_up(-(-B_p // 2), _SUBLANE))
        cap = max(_round_up(cap, _SUBLANE), _SUBLANE)

        bt = _SUBLANE
        for cand in range(cap, _SUBLANE - 1, -_SUBLANE):
            waste = (-B_p) % cand
            if waste * 8 <= B_p:               # at most ~12.5% dead batch rows
                bt = cand
                break
        B_p = _round_up(B_p, bt)

        # ---- explicit VMEM budget for the compiler (clamped to physical).
        limit = vmem_limit_bytes
        if limit is None:
            need = wbytes + bt * per_row
            limit = int(min(phys_vmem - (1 << 20),
                            max(32 << 20, need + (8 << 20))))

        cost = pl.CostEstimate(
            flops=int(2 * B_p * (in_p * hid_p + hid_p * out_p)),
            transcendentals=int(2 * B_p * out_p),      # sigmoid: exp + reciprocal
            bytes_accessed=int(B_p * in_p * x_item
                               + (in_p * hid_p + hid_p * out_p) * w_item
                               + (hid_p + out_p) * 4
                               + B_p * out_p * out_item),
        )
        return dict(B_p=B_p, bt=bt, ht=ht, vmem_limit_bytes=limit, cost=cost)

    def _build(plan, out_dtype, single_buffer_weights):
        bt, ht, B_p = plan["bt"], plan["ht"], plan["B_p"]
        grid = (B_p // bt, hid_p // ht)

        # Constant-index weights gain nothing from double-buffering; keep one
        # resident copy and spend the freed VMEM on a larger batch tile.
        single = (single_buffer_weights and grid[1] == 1
                  and hasattr(pl, "Buffered"))

        def wspec(shape, index_map):
            if single:
                return pl.BlockSpec(shape, index_map,
                                    pipeline_mode=pl.Buffered(buffer_count=1))
            return pl.BlockSpec(shape, index_map)

        return pl.pallas_call(
            mlp_kernel,
            out_shape=jax.ShapeDtypeStruct((B_p, out_p), out_dtype),
            grid_spec=pltpu.PrefetchScalarGridSpec(
                num_scalar_prefetch=0,
                grid=grid,
                in_specs=[
                    pl.BlockSpec((bt, in_p), lambda i, k: (i, 0)),   # x
                    wspec((in_p, ht), lambda i, k: (0, k)),          # W1 k-tile
                    wspec((1, ht), lambda i, k: (0, k)),             # b1 k-tile
                    wspec((ht, out_p), lambda i, k: (k, 0)),         # W2 k-tile
                    wspec((1, out_p), lambda i, k: (0, 0)),          # b2
                ],
                out_specs=pl.BlockSpec((bt, out_p), lambda i, k: (i, 0)),
                scratch_shapes=[pltpu.VMEM((bt, out_p), jnp.float32)],
            ),
            compiler_params=pltpu.CompilerParams(
                dimension_semantics=("parallel", "arbitrary"),
                vmem_limit_bytes=plan["vmem_limit_bytes"],
            ),
            cost_estimate=plan["cost"],
        )

    def _make_fn(B, x_dtype, single_buffer_weights):
        compute_dtype = jnp.bfloat16 if cast_to_bf16 else x_dtype
        out_dtype = x_dtype
        plan = _plan(B, compute_dtype, out_dtype)
        call = _build(plan, out_dtype, single_buffer_weights)
        B_p = plan["B_p"]
        needs_pad = (B_p != B) or (in_p != in_size)
        needs_slice = (B_p != B) or (out_p != out_size)

        def fwd(x2d, w1p_, b1p_, w2p_, b2p_):
            xin = x2d.astype(compute_dtype) if x2d.dtype != compute_dtype else x2d
            if needs_pad:
                xp = jnp.zeros((B_p, in_p), compute_dtype).at[:B, :in_size].set(xin)
            else:
                xp = xin
            out = call(xp, w1p_, b1p_, w2p_, b2p_)
            if needs_slice:
                out = out[:B, :out_size]
            return out

        return jax.jit(fwd)

    cache = {}

    def forward(x):
        """Forward pass; accepts (..., in_size) and returns (..., out_size)."""
        assert x.shape[-1] == in_size
        lead = x.shape[:-1]
        x2d = x.reshape(-1, in_size)
        B = x2d.shape[0]
        key = (B, x2d.dtype)
        try:
            if key not in cache:
                cache[key] = _make_fn(B, x2d.dtype, single_buffer_weights=True)
            out = cache[key](x2d, w1p, b1p, w2p, b2p)
        except (TypeError, ValueError, NotImplementedError,
                pltpu.LoweringException):
            # Narrow capability probe: this jax build rejects
            # pipeline_mode=pl.Buffered(buffer_count=1). Rebuild with default
            # double-buffered weight specs; genuine failures (VMEM OOM, runtime
            # errors) re-raise from this fallback path instead of being masked.
            cache[key] = _make_fn(B, x2d.dtype, single_buffer_weights=False)
            out = cache[key](x2d, w1p, b1p, w2p, b2p)
        return out.reshape(*lead, out_size)

    return forward


def mlp_forward(x, w1, b1, w2, b2, **kwargs):
    """One-shot convenience wrapper. For repeated calls build the forward fn once
    with make_mlp(...) so parameter padding is not redone every call."""
    return make_mlp(w1, b1, w2, b2, **kwargs)(x)


def reference_mlp(x, w1, b1, w2, b2):
    h = jnp.maximum(x @ w1 + b1, 0.0)
    return jax.nn.sigmoid(h @ w2 + b2)


if __name__ == "__main__":
    # config = {'in_size': 32, 'hidden_dims': 64, 'out_size': 16,
    #           'in_dpout': 0.0, 'hidden_dpout': 0.0}; eval() mode -> dropout = id.
    key = jax.random.PRNGKey(0)

    def init_params(k, in_size, hidden, out_size):
        kw1, kb1, kw2, kb2 = jax.random.split(k, 4)
        lim1 = 1.0 / (in_size ** 0.5)
        lim2 = 1.0 / (hidden ** 0.5)
        w1 = jax.random.uniform(kw1, (in_size, hidden), minval=-lim1, maxval=lim1,
                                dtype=jnp.float32)
        b1 = jax.random.uniform(kb1, (hidden,), minval=-lim1, maxval=lim1,
                                dtype=jnp.float32)
        w2 = jax.random.uniform(kw2, (hidden, out_size), minval=-lim2, maxval=lim2,
                                dtype=jnp.float32)
        b2 = jax.random.uniform(kb2, (out_size,), minval=-lim2, maxval=lim2,
                                dtype=jnp.float32)
        return w1, b1, w2, b2

    k0, k1, kx0, kx1 = jax.random.split(key, 4)

    # --- 1) spec-sized case: tiny, unpadded fast path -------------------------
    batch, in_size, hidden, out_size = 8, 32, 64, 16
    w1, b1, w2, b2 = init_params(k0, in_size, hidden, out_size)
    x = jax.random.normal(kx0, (batch, in_size), dtype=jnp.float32)

    fwd = make_mlp(w1, b1, w2, b2)
    out = jax.block_until_ready(fwd(x))
    ref = reference_mlp(x, w1, b1, w2, b2)
    assert out.shape == (batch, out_size)
    assert jnp.allclose(out, ref, atol=1e-5, rtol=1e-5), "tiny-path mismatch"

    # --- 2) padded + hidden-streaming path (odd dims, batch not /8) -----------
    batch2, in2, hid2, outsz2 = 60, 200, 384, 130
    w1b, b1b, w2b, b2b = init_params(k1, in2, hid2, outsz2)
    x2 = jax.random.normal(kx1, (batch2, in2), dtype=jnp.float32)

    fwd2 = make_mlp(w1b, b1b, w2b, b2b, hidden_tile=128)   # force 3 hidden k-steps
    out2 = jax.block_until_ready(fwd2(x2))
    ref2 = reference_mlp(x2, w1b, b1b, w2b, b2b)
    assert out2.shape == (batch2, outsz2)
    assert jnp.allclose(out2, ref2, atol=3e-5, rtol=3e-5), "streaming-path mismatch"

    print("KERNEL_OK")
</pallas_src>

<mosaic_0001>
module attributes {stable_mosaic.version = 11 : i64} {
  func.func @mlp_kernel(%arg0: i32, %arg1: i32, %arg2: memref<8x32xf32, #tpu.memory_space<vmem>>, %arg3: memref<32x64xf32, #tpu.memory_space<vmem>>, %arg4: memref<1x64xf32, #tpu.memory_space<vmem>>, %arg5: memref<64x16xf32, #tpu.memory_space<vmem>>, %arg6: memref<1x16xf32, #tpu.memory_space<vmem>>, %arg7: memref<8x16xf32, #tpu.memory_space<vmem>>, %arg8: memref<8x16xf32, #tpu.memory_space<vmem>>) attributes {dimension_semantics = [#tpu.dimension_semantics<parallel>, #tpu.dimension_semantics<arbitrary>], iteration_bounds = array<i64: 1, 1>, scalar_prefetch = 0 : i64, scratch_operands = 1 : i64, tpu.core_type = #tpu.core_type<tc>, window_params = [{transform_indices = @transform_0, window_bounds = array<i64: 8, 32>}, {pipeline_mode = #tpu.pipeline_mode<synchronous>, transform_indices = @transform_1, window_bounds = array<i64: 32, 64>}, {pipeline_mode = #tpu.pipeline_mode<synchronous>, transform_indices = @transform_2, window_bounds = array<i64: 1, 64>}, {pipeline_mode = #tpu.pipeline_mode<synchronous>, transform_indices = @transform_3, window_bounds = array<i64: 64, 16>}, {pipeline_mode = #tpu.pipeline_mode<synchronous>, transform_indices = @transform_4, window_bounds = array<i64: 1, 16>}, {transform_indices = @transform_5, window_bounds = array<i64: 8, 16>}]} {
    %c0_i32 = arith.constant 0 : i32
    %0 = arith.cmpi eq, %arg1, %c0_i32 : i32
    %1 = arith.extui %0 : i1 to i32
    %c0_i32_0 = arith.constant 0 : i32
    %2 = arith.cmpi ne, %1, %c0_i32_0 : i32
    scf.if %2 {
      %cst_16 = arith.constant 0.000000e+00 : f32
      %19 = vector.broadcast %cst_16 : f32 to vector<8x16xf32>
      %c0_17 = arith.constant 0 : index
      %c0_18 = arith.constant 0 : index
      %20 = vector.load %arg8[%c0_17, %c0_18] : memref<8x16xf32, #tpu.memory_space<vmem>>, vector<8x16xf32>
      tpu.vector_store %arg8[%c0_17, %c0_18], %19 {strides = array<i32>} : memref<8x16xf32, #tpu.memory_space<vmem>>, vector<8x16xf32>,
    } else {
    }
    %c0 = arith.constant 0 : index
    %c0_1 = arith.constant 0 : index
    %3 = vector.load %arg2[%c0, %c0_1] : memref<8x32xf32, #tpu.memory_space<vmem>>, vector<8x32xf32>
    %c0_2 = arith.constant 0 : index
    %c0_3 = arith.constant 0 : index
    %4 = vector.load %arg3[%c0_2, %c0_3] : memref<32x64xf32, #tpu.memory_space<vmem>>, vector<32x64xf32>
    %cst = arith.constant dense<0.000000e+00> : vector<8x64xf32>
    %5 = tpu.matmul %3, %4, %cst {dimension_numbers = #tpu.dot_dimension_numbers<[1], [0], [0], [1], [0, 0, 1, 1], [], []>} : vector<8x32xf32>, vector<32x64xf32>, vector<8x64xf32> -> vector<8x64xf32>
    %c0_4 = arith.constant 0 : index
    %c0_5 = arith.constant 0 : index
    %6 = vector.load %arg4[%c0_4, %c0_5] : memref<1x64xf32, #tpu.memory_space<vmem>>, vector<1x64xf32>
    %7 = vector.broadcast %6 : vector<1x64xf32> to vector<8x64xf32>
    %8 = arith.addf %5, %7 : vector<8x64xf32>
    %cst_6 = arith.constant 0.000000e+00 : f32
    %9 = vector.broadcast %cst_6 : f32 to vector<8x64xf32>
    %10 = arith.maximumf %8, %9 : vector<8x64xf32>
    %c0_7 = arith.constant 0 : index
    %c0_8 = arith.constant 0 : index
    %11 = vector.load %arg8[%c0_7, %c0_8] : memref<8x16xf32, #tpu.memory_space<vmem>>, vector<8x16xf32>
    %c0_9 = arith.constant 0 : index
    %c0_10 = arith.constant 0 : index
    %12 = vector.load %arg5[%c0_9, %c0_10] : memref<64x16xf32, #tpu.memory_space<vmem>>, vector<64x16xf32>
    %cst_11 = arith.constant dense<0.000000e+00> : vector<8x16xf32>
    %13 = tpu.matmul %10, %12, %cst_11 {dimension_numbers = #tpu.dot_dimension_numbers<[1], [0], [0], [1], [0, 0, 1, 1], [], []>} : vector<8x64xf32>, vector<64x16xf32>, vector<8x16xf32> -> vector<8x16xf32>
    %14 = arith.addf %11, %13 : vector<8x16xf32>
    %c0_12 = arith.constant 0 : index
    %c0_13 = arith.constant 0 : index
    %15 = vector.load %arg8[%c0_12, %c0_13] : memref<8x16xf32, #tpu.memory_space<vmem>>, vector<8x16xf32>
    tpu.vector_store %arg8[%c0_12, %c0_13], %14 {strides = array<i32>} : memref<8x16xf32, #tpu.memory_space<vmem>>, vector<8x16xf32>,
    %c0_i32_14 = arith.constant 0 : i32
    %16 = arith.cmpi eq, %arg1, %c0_i32_14 : i32
    %17 = arith.extui %16 : i1 to i32
    %c0_i32_15 = arith.constant 0 : i32
    %18 = arith.cmpi ne, %17, %c0_i32_15 : i32
    scf.if %18 {
      %c0_16 = arith.constant 0 : index
      %c0_17 = arith.constant 0 : index
      %19 = vector.load %arg8[%c0_16, %c0_17] : memref<8x16xf32, #tpu.memory_space<vmem>>, vector<8x16xf32>
      %c0_18 = arith.constant 0 : index
      %c0_19 = arith.constant 0 : index
      %20 = vector.load %arg6[%c0_18, %c0_19] : memref<1x16xf32, #tpu.memory_space<vmem>>, vector<1x16xf32>
      %21 = vector.broadcast %20 : vector<1x16xf32> to vector<8x16xf32>
      %22 = arith.addf %19, %21 : vector<8x16xf32>
      %23 = arith.negf %22 : vector<8x16xf32>
      %24 = math.exp %23 : vector<8x16xf32>
      %cst_20 = arith.constant 1.000000e+00 : f32
      %25 = vector.broadcast %cst_20 : f32 to vector<8x16xf32>
      %26 = arith.addf %25, %24 : vector<8x16xf32>
      %27 = arith.divf %25, %26 : vector<8x16xf32>
      %c0_21 = arith.constant 0 : index
      %c0_22 = arith.constant 0 : index
      %28 = vector.load %arg7[%c0_21, %c0_22] : memref<8x16xf32, #tpu.memory_space<vmem>>, vector<8x16xf32>
      tpu.vector_store %arg7[%c0_21, %c0_22], %27 {strides = array<i32>} : memref<8x16xf32, #tpu.memory_space<vmem>>, vector<8x16xf32>,
    } else {
    }
    return
  }
  func.func @transform_0(%arg0: i32, %arg1: i32) -> (i32, i32) {
    %c0_i32 = arith.constant 0 : i32
    %c0_i32_0 = arith.constant 0 : i32
    return %arg0, %c0_i32 : i32, i32
  }
  func.func @transform_1(%arg0: i32, %arg1: i32) -> (i32, i32) {
    %c0_i32 = arith.constant 0 : i32
    %c0_i32_0 = arith.constant 0 : i32
    return %c0_i32, %arg1 : i32, i32
  }
  func.func @transform_2(%arg0: i32, %arg1: i32) -> (i32, i32) {
    %c0_i32 = arith.constant 0 : i32
    %c0_i32_0 = arith.constant 0 : i32
    return %c0_i32, %arg1 : i32, i32
  }
  func.func @transform_3(%arg0: i32, %arg1: i32) -> (i32, i32) {
    %c0_i32 = arith.constant 0 : i32
    %c0_i32_0 = arith.constant 0 : i32
    return %arg1, %c0_i32 : i32, i32
  }
  func.func @transform_4(%arg0: i32, %arg1: i32) -> (i32, i32) {
    %c0_i32 = arith.constant 0 : i32
    %c0_i32_0 = arith.constant 0 : i32
    %c0_i32_1 = arith.constant 0 : i32
    return %c0_i32, %c0_i32_0 : i32, i32
  }
  func.func @transform_5(%arg0: i32, %arg1: i32) -> (i32, i32) {
    %c0_i32 = arith.constant 0 : i32
    %c0_i32_0 = arith.constant 0 : i32
    return %arg0, %c0_i32 : i32, i32
  }
}

</mosaic_0001>

<bundles_post_ra>
// kernel: fwd.1
= control target key start
LH: loop header
LB: loop body
LE: loop exit
PB: predicated region body
PF: predicated region fallthrough
CT: control target
= control target key end

     0   :  { %s262_s0 = inlined_call_operand.vmem [shape: f32[8,32], index: 0, kind: input, shape index: {}]   ;;  %s263_s1 = inlined_call_operand.vmem [shape: f32[32,64], index: 1, kind: input, shape index: {}]   ;;  %s264_s2 = inlined_call_operand.vmem [shape: f32[1,64], index: 2, kind: input, shape index: {}]   ;;  %s265_s3 = inlined_call_operand.vmem [shape: f32[64,16], index: 3, kind: input, shape index: {}]   ;;  %s266_s4 = inlined_call_operand.vmem [shape: f32[1,16], index: 4, kind: input, shape index: {}]   ;;  %s267_s5 = inlined_call_operand.hbm [shape: f32[8,16], index: 5, kind: output, shape index: {}]  }
   0x1   :  { %v31_v0 = vld [vmem:[%s263_s1 + $0x18] sm:$0xff]  ;;  %v30_v1 = vld [vmem:[%s263_s1 + $0x10] sm:$0xff]  ;;  %v29_v3 = vld [vmem:[%s263_s1 + $0x8] sm:$0xff] }
   0x2   :  { %52 = vmatpush.msra.mxu0 %v31_v0  ;;  %v69_v2 = vld [vmem:[%s265_s3 + $0x38] sm:$0xff]  ;;  %v68_v4 = vld [vmem:[%s265_s3 + $0x30] sm:$0xff]  ;;  %v67_v5 = vld [vmem:[%s265_s3 + $0x28] sm:$0xff] }
   0x3   :  { %82 = vmatpush.msra.mxu1 %v69_v2  ;;  %v28_v6 = vld [vmem:[%s263_s1] sm:$0xff] }
   0x4   :  { %53 = vmatpush.msra.mxu0 %v30_v1 }
   0x5   :  { %83 = vmatpush.msra.mxu1 %v68_v4 }
   0x6   :  { %10 = vsyncpa [#allocation4], 0  ;;  %54 = vmatpush.msra.mxu0 %v29_v3  ;;  %v27_v7 = vld [vmem:[%s262_s0] sm:$0xff]  ;;  %vm36_vm0 = vcmask 261120   ;;  %v65_v9 = vld [vmem:[%s265_s3 + $0x18] sm:$0xff]  ;;  %vm25_vm1 = vcmask 130048  }
   0x7   :  { %v66_v8 = vld [vmem:[%s265_s3 + $0x20] sm:$0xff]  ;;  %84 = vmatpush.msra.mxu1 %v67_v5  ;;  %v64_v10 = vld [vmem:[%s265_s3 + $0x10] sm:$0xff]  ;;  %v63_v11 = vld [vmem:[%s265_s3 + $0x8] sm:$0xff]  ;;  %v179_v13 = vmov 0.0   ;;  %vm70_vm2 = vcmask 523264  }
   0x8   :  { %55 = vmatpush.msra.mxu0 %v28_v6  ;;  %v62_v12 = vld [vmem:[%s265_s3] sm:$0xff]  ;;  %26 = vst.msk [vmem:[#allocation2] sm:$0xff] %vm25_vm1, %v179_v13 }
   0x9   :  { %142 = vmatmul.msk.f32.vlgmr.msra.gmra.mxu0 %vm36_vm0, %v27_v7  ;;  %85 = vmatpush.msra.mxu1 %v66_v8  ;;  %v147_v14 = vld [vmem:[%s264_s2] ss:$0 sm:$0xff]  ;;  %s180_s2 = smov [#allocation3]  }
   0xa   :  { %v148_v21 = vld [vmem:[%s266_s4] ss:$0 sm:$0xff]  ;;  %s131_s20 = sshll.u32 %s180_s2, 4  ;;  %s133_s4 = sshll.u32 %s267_s5, 4  ;;  %s132_s20 = int_to_ptr.vmem [resolvable:$true] %s131_s20  ;;  %s134_s4 = int_to_ptr.hbm [resolvable:$true] %s133_s4 }
   0xb   :  { %86 = vmatpush.msra.mxu1 %v65_v9 }
   0xd   :  { %87 = vmatpush.msra.mxu1 %v64_v10 }
   0xf   :  { %88 = vmatpush.msra.mxu1 %v63_v11  ;;  %v61_v18 = vld [vmem:[#allocation2] sm:$0xff] }
  0x11   :  { %89 = vmatpush.msra.mxu1 %v62_v12 }
  0x86   :  { %v57_v15 = vpop.f32.mrf.mxu0 }
  0x87   :  { %v58_v16 = vadd.f32 %v147_v14, %v57_v15 }
  0x89   :  { %v60_v17 = vmax.f32 %v58_v16, 0.0 }
  0x8b   :  { %143 = vmatmul.msk.f32.vlgmr.msra.gmra.mxu1 %vm70_vm2, %v60_v17 }
 0x108   :  { %v91_v19 = vpop.f32.mrf.mxu1 }
 0x109   :  { %v94_v20 = vadd.f32 %v91_v19, %v61_v18 }
 0x10b   :  { %96 = vst.msk [vmem:[#allocation2] sm:$0xff] %vm25_vm1, %v94_v20 }
 0x112   :  { %v100_v22 = vld [vmem:[#allocation2] sm:$0xff] }
 0x113   :  { %v105_v23 = vadd.f32 %v148_v21, %v100_v22 }
 0x115   :  { %v144_v24 = vmul.f32 -1.442695, %v105_v23 }
 0x117   :  { %149 = vpow2.f32 %v144_v24 }
 0x11d   :  { %v150_v25 = vpop.eup %149 }
 0x11e   :  { %v109_v26 = vadd.f32 1.0, %v150_v25 }
 0x120   :  { %151 = vrcp.f32 %v109_v26  ;;  %v121_v30 = vand.u32 2147483648, %v109_v26  ;;  %v119_v32 = vand.u32 2147483647, %v109_v26  ;;  %vm115_vm4 = vweird.f32 %v109_v26 }
 0x122   :  { %v122_v34 = vor.u32 1.1754944e-38, %v121_v30  ;;  %vm120_vm6 = vcmp.eq.f32.partialorder %v119_v32, 8.507059e+37 }
 0x126   :  { %v152_v27 = vpop.eup %151 }
 0x127   :  { %v111_v28 = vmul.f32 %v152_v27, %v109_v26  ;;  %vm116_vm3 = vweird.f32 %v152_v27 }
 0x128   :  { %vm117_vm5 = vmor %vm115_vm4, %vm116_vm3 }
 0x129   :  { %v112_v29 = vsub.f32 1.0, %v111_v28 }
 0x12b   :  { %v113_v31 = vmul.f32 %v152_v27, %v112_v29 }
 0x12d   :  { %v114_v33 = vadd.f32 %v152_v27, %v113_v31 }
 0x12f   :  { %v118_v35 = vsel %vm117_vm5, %v152_v27, %v114_v33 }
 0x130   :  { %v123_v36 = vsel %vm120_vm6, %v122_v34, %v118_v35 }
 0x131   :  { %125 = vst.msk [vmem:[#allocation3] sm:$0xff] %vm25_vm1, %v123_v36 }
 0x132   :  { %136 = dma.vmem_to_hbm [thread:$0]  %s132_s20, 128, %s134_s4, [#allocation4]  }
 0x133   :  { %177 = dma.done.wait [#allocation4], 128  }
 0x134   :  { %178 = vsyncadd [#allocation4], 4294967168 }
 0x135   :  { %141 = vsyncpa [#allocation4], 1 }

</bundles_post_ra>
